<compile_context>
chip_gen: v6e
topology: v6e:2x2x1
jax: 0.10.0
libtpu: 0.0.40
codegen_flags: <defaults>
</compile_context>

<pallas_src>
import math

import jax
import jax.numpy as jnp
from jax.experimental import pallas as pl
from jax.experimental.pallas import tpu as pltpu


# Total resident VMEM budget for the pipelined blocks: 2x pe + 2x in + 2x out
# (each stream is double-buffered by the Pallas pipeliner).  12 MiB keeps us
# inside v5e's 16 MiB default scoped VMEM and far inside v7x's 64 MiB physical
# VMEM, so no vmem_limit_bytes override is needed on any generation.
_VMEM_BUDGET_BYTES = 12 << 20


def _add_pe_kernel(pe_ref, x_ref, o_ref):
    """pe_ref: (tr, cols); x_ref / o_ref: (tr, cols) (batch dim squeezed)."""
    o_ref[...] = (x_ref[...] + pe_ref[...]).astype(o_ref.dtype)


def _build_pe(h, w, C, dtype):
    """Separable 2D sinusoidal PE, matching the PyTorch _build_pe.

    pe[n = y*w + x, 2i]   = sin(y * div[i]) + sin(x * div[i])
    pe[n = y*w + x, 2i+1] = cos(y * div[i]) + cos(x * div[i])
    Only O((h + w) * C) transcendentals are evaluated; this is batch-invariant
    so it runs once in the wrapper, never in the kernel.
    """
    i = jnp.arange(0, C, 2, dtype=jnp.float32)                 # (C//2,)
    div_term = jnp.exp(i * (-math.log(10000.0) / C))           # (C//2,)
    pos_h = jnp.arange(h, dtype=jnp.float32)[:, None]          # (h, 1)
    pos_w = jnp.arange(w, dtype=jnp.float32)[:, None]          # (w, 1)
    ang_h = pos_h * div_term                                   # (h, C//2)
    ang_w = pos_w * div_term                                   # (w, C//2)
    # Interleave sin (even channels) / cos (odd channels).
    pe_y = jnp.stack([jnp.sin(ang_h), jnp.cos(ang_h)], axis=-1).reshape(h, C)
    pe_x = jnp.stack([jnp.sin(ang_w), jnp.cos(ang_w)], axis=-1).reshape(w, C)
    pe = pe_y[:, None, :] + pe_x[None, :, :]                   # (h, w, C)
    return pe.reshape(h * w, C).astype(dtype)                  # (N, C)


def _cdiv(a, b):
    return -(-a // b)


def _choose_row_tile(rows, cols, x_itemsize, pe_itemsize, batch):
    """~2 MiB row blocks, budgeted against all six resident (double-buffered)
    blocks.  Guarantees >= 2 total grid steps when batch == 1 so v7x's two
    TensorCores both get work."""
    per_row = cols * (4 * x_itemsize + 2 * pe_itemsize)   # 2x in + 2x out + 2x pe
    cap = max(8, (_VMEM_BUDGET_BYTES // per_row) // 8 * 8)
    tr = min(rows, cap)
    min_steps = 2 if batch == 1 else 1
    while batch * _cdiv(rows, tr) < min_steps and tr > 8:
        tr = max(8, (tr // 2) // 8 * 8)
    return tr


def spatial_positional_encoding_2d(x, h, w, *, donate_x=False):
    """x: (B, N, C), N == h * w.  Returns x + pe (eval-mode dropout = identity)."""
    B, N, C = x.shape
    if N != h * w:
        raise ValueError("Number of patches does not match spatial dims")
    if C % 2 != 0:
        raise ValueError("embed_dim must be even")

    # pe in x's dtype for f32/bf16 inputs (halves pe footprint for bf16), else f32.
    if x.dtype in (jnp.dtype(jnp.float32), jnp.dtype(jnp.bfloat16)):
        pe_dtype = x.dtype
    else:
        pe_dtype = jnp.float32
    pe = _build_pe(h, w, C, pe_dtype)                          # (N, C)

    # Lane-dense view: last dim a multiple of 128.  If C itself is not, flatten
    # the (N, C) trailing axes row-major and zero-pad to the next lane multiple.
    total = N * C
    pad = 0
    if C % 128 == 0:
        rows, cols = N, C
        x2, pe2 = x, pe
    else:
        cols = 128
        rows = _cdiv(total, cols)
        pad = rows * cols - total
        xf = x.reshape(B, total)
        pef = pe.reshape(total)
        if pad:
            xf = jnp.pad(xf, ((0, 0), (0, pad)))
            pef = jnp.pad(pef, ((0, pad),))
        x2 = xf.reshape(B, rows, cols)
        pe2 = pef.reshape(rows, cols)

    x_item = x.dtype.itemsize
    pe_item = jnp.dtype(pe_dtype).itemsize
    tr = _choose_row_tile(rows, cols, x_item, pe_item, B)
    grid = (_cdiv(rows, tr), B)   # row blocks outer, batch inner -> pe stays resident

    cost = pl.CostEstimate(
        flops=B * rows * cols,
        transcendentals=0,
        bytes_accessed=2 * B * rows * cols * x_item + rows * cols * pe_item,
    )

    call_kwargs = {}
    if donate_x:
        # x2 is positional input 1 (after pe2); reuse its HBM buffer for the
        # output when the caller donates x.
        call_kwargs["input_output_aliases"] = {1: 0}

    out2 = pl.pallas_call(
        _add_pe_kernel,
        out_shape=jax.ShapeDtypeStruct((B, rows, cols), x.dtype),
        grid_spec=pltpu.PrefetchScalarGridSpec(
            num_scalar_prefetch=0,
            grid=grid,
            in_specs=[
                # PE block: constant across the inner batch axis -> no re-DMA.
                pl.BlockSpec((tr, cols), lambda j, b: (j, 0)),
                # Streamed input; leading batch dim squeezed out of the kernel ref.
                pl.BlockSpec((None, tr, cols), lambda j, b: (b, j, 0)),
            ],
            out_specs=pl.BlockSpec((None, tr, cols), lambda j, b: (b, j, 0)),
        ),
        compiler_params=pltpu.CompilerParams(
            dimension_semantics=("parallel", "parallel")),
        cost_estimate=cost,
        **call_kwargs,
    )(pe2, x2)

    if C % 128 == 0:
        return out2
    out_flat = out2.reshape(B, rows * cols)
    if pad:
        out_flat = out_flat[:, :total]
    return out_flat.reshape(B, N, C)


def _reference(x, h, w):
    """Literal plain-JAX port of the PyTorch _build_pe + add, for verification."""
    B, N, C = x.shape
    i = jnp.arange(0, C, 2).astype(jnp.float32)
    div_term = jnp.exp(i * (-math.log(10000.0) / C))           # (C/2,)
    pos_h = jnp.arange(h, dtype=jnp.float32)[:, None]          # (h,1)
    pos_w = jnp.arange(w, dtype=jnp.float32)[:, None]          # (w,1)

    pe = jnp.zeros((C, h, w), jnp.float32)
    pe = pe.at[0::2].set(jnp.sin(pos_h * div_term).T[:, :, None].repeat(w, axis=2))
    pe = pe.at[1::2].set(jnp.cos(pos_h * div_term).T[:, :, None].repeat(w, axis=2))
    pe_w = jnp.zeros((C, h, w), jnp.float32)
    pe_w = pe_w.at[0::2].set(jnp.sin(pos_w * div_term).T[:, None, :].repeat(h, axis=1))
    pe_w = pe_w.at[1::2].set(jnp.cos(pos_w * div_term).T[:, None, :].repeat(h, axis=1))
    pe = pe + pe_w                                             # (C, h, w)
    pe = pe.reshape(C, h * w).T[None]                          # (1, N, C)
    return x + pe


if __name__ == "__main__":
    key = jax.random.PRNGKey(0)
    k0, k1, k2 = jax.random.split(key, 3)

    # Case 1 (lane-dense flatten path): C=32 < 128, N*C a multiple of 128.
    B, h, w, C = 2, 8, 8, 32
    x = jax.random.normal(k0, (B, h * w, C), dtype=jnp.float32)
    out = jax.block_until_ready(spatial_positional_encoding_2d(x, h, w))
    assert out.shape == (B, h * w, C) and out.dtype == x.dtype
    assert jnp.allclose(out, _reference(x, h, w), atol=1e-5, rtol=1e-5), \
        "mismatch (lane-dense path)"

    # Case 2 (padded path): N*C not a multiple of 128 -> zero-pad to 128 lanes.
    B2, h2, w2, C2 = 2, 5, 5, 20
    x2 = jax.random.normal(k1, (B2, h2 * w2, C2), dtype=jnp.float32)
    out2 = jax.block_until_ready(spatial_positional_encoding_2d(x2, h2, w2))
    assert jnp.allclose(out2, _reference(x2, h2, w2), atol=1e-5, rtol=1e-5), \
        "mismatch (padded path)"

    # Case 3 (bf16, B=1): bf16 pe + bf16 add; tile halved so both v7x
    # TensorCores get a block even with a single batch element.
    B3, h3, w3, C3 = 1, 16, 16, 64
    x3 = jax.random.normal(k2, (B3, h3 * w3, C3), dtype=jnp.bfloat16)
    out3 = jax.block_until_ready(spatial_positional_encoding_2d(x3, h3, w3))
    ref3 = _reference(x3.astype(jnp.float32), h3, w3)
    assert out3.dtype == jnp.bfloat16
    assert jnp.allclose(out3.astype(jnp.float32), ref3, atol=6e-2, rtol=5e-2), \
        "mismatch (bf16 path)"

    print("KERNEL_OK")
</pallas_src>

<mosaic_0001>
module attributes {stable_mosaic.version = 11 : i64} {
  func.func @_add_pe_kernel(%arg0: i32, %arg1: i32, %arg2: memref<16x128xf32, #tpu.memory_space<vmem>>, %arg3: memref<1x16x128xf32, #tpu.memory_space<vmem>>, %arg4: memref<1x16x128xf32, #tpu.memory_space<vmem>>) attributes {dimension_semantics = [#tpu.dimension_semantics<parallel>, #tpu.dimension_semantics<parallel>], iteration_bounds = array<i64: 1, 2>, scalar_prefetch = 0 : i64, scratch_operands = 0 : i64, tpu.core_type = #tpu.core_type<tc>, window_params = [{transform_indices = @transform_0, window_bounds = array<i64: 16, 128>}, {transform_indices = @transform_1, window_bounds = array<i64: 1, 16, 128>}, {transform_indices = @transform_2, window_bounds = array<i64: 1, 16, 128>}]} {
    %c0 = arith.constant 0 : index
    %c0_0 = arith.constant 0 : index
    %c0_1 = arith.constant 0 : index
    %0 = vector.load %arg3[%c0, %c0_0, %c0_1] : memref<1x16x128xf32, #tpu.memory_space<vmem>>, vector<1x16x128xf32>
    %1 = vector.shape_cast %0 : vector<1x16x128xf32> to vector<16x128xf32>
    %c0_2 = arith.constant 0 : index
    %c0_3 = arith.constant 0 : index
    %2 = vector.load %arg2[%c0_2, %c0_3] : memref<16x128xf32, #tpu.memory_space<vmem>>, vector<16x128xf32>
    %3 = arith.addf %1, %2 : vector<16x128xf32>
    %c0_4 = arith.constant 0 : index
    %c0_5 = arith.constant 0 : index
    %c0_6 = arith.constant 0 : index
    %4 = vector.load %arg4[%c0_4, %c0_5, %c0_6] : memref<1x16x128xf32, #tpu.memory_space<vmem>>, vector<1x16x128xf32>
    %5 = vector.shape_cast %4 : vector<1x16x128xf32> to vector<16x128xf32>
    %6 = vector.shape_cast %3 : vector<16x128xf32> to vector<1x16x128xf32>
    tpu.vector_store %arg4[%c0_4, %c0_5, %c0_6], %6 {strides = array<i32>} : memref<1x16x128xf32, #tpu.memory_space<vmem>>, vector<1x16x128xf32>,
    return
  }
  func.func @transform_0(%arg0: i32, %arg1: i32) -> (i32, i32) {
    %c0_i32 = arith.constant 0 : i32
    %c0_i32_0 = arith.constant 0 : i32
    return %arg0, %c0_i32 : i32, i32
  }
  func.func @transform_1(%arg0: i32, %arg1: i32) -> (i32, i32, i32) {
    %c0_i32 = arith.constant 0 : i32
    %c0_i32_0 = arith.constant 0 : i32
    return %arg1, %arg0, %c0_i32 : i32, i32, i32
  }
  func.func @transform_2(%arg0: i32, %arg1: i32) -> (i32, i32, i32) {
    %c0_i32 = arith.constant 0 : i32
    %c0_i32_0 = arith.constant 0 : i32
    return %arg1, %arg0, %c0_i32 : i32, i32, i32
  }
}

</mosaic_0001>

<bundles_post_ra>
// kernel: tpu_custom_call.1
= control target key start
LH: loop header
LB: loop body
LE: loop exit
PB: predicated region body
PF: predicated region fallthrough
CT: control target
= control target key end

     0   :  { %7 = vsyncpa [#allocation3], 0  ;;  %s776_s0 = inlined_call_operand.hbm [shape: f32[16,128], index: 0, kind: input, shape index: {}]   ;;  %s777_s1 = inlined_call_operand.hbm [shape: f32[2,16,128], index: 1, kind: input, shape index: {}]   ;;  %s778_s2 = inlined_call_operand.hbm [shape: f32[2,16,128], index: 2, kind: output, shape index: {}]  }
   0x1   :  { %8 = vsyncpa [#allocation6], 0 }
   0x2   :  { %10 = vsyncpa [#allocation6 + $0x1], 0 }
   0x3   :  { %11 = vsyncpa [#allocation4], 0 }
   0x4   :  { %13 = vsyncpa [#allocation4 + $0x1], 0  ;;  %s589_s9 = smov 0   ;;  %s591_s10 = smov 0  }
   0x5   :  { %s593_s11 = smov 0   ;;  %s595_s12 = smov 0  }
   0x6   :  { %s597_s13 = smov 0   ;;  %s599_s14 = smov 0  }
   0x7 LB: > { %s331_s15 = sadd.s32 4294967295, %s565_s14   ;;  %s332_s16 = sadd.s32 4294967294, %s565_s14   ;;  %s565_s14 = sphi %s599_s14, %s19_s14   ;;  %s561_s13 = sphi %s597_s13, %s798_s13   ;;  %s557_s12 = sphi %s595_s12, %s797_s12   ;;  %s553_s11 = sphi %s593_s11, %s796_s11   ;;  %s549_s10 = sphi %s591_s10, %s795_s10   ;;  %s545_s9 = sphi %s589_s9, %s794_s9  }
   0x8   : > { %p79_p0 = scmp.ne.s32.totalorder %s549_s10, %s545_s9  ;;  %p623_p1 = scmp.eq.s32.totalorder %s331_s15, 0 }
   0x9   : > { %p627_p2 = scmp.eq.s32.totalorder %s331_s15, 1  ;;  %p111_p3 = scmp.eq.s32.totalorder %s332_s16, 1 }
   0xa   : > { %p633_p4 = por %p623_p1, %p79_p0  ;;  %p333_p5 = scmp.ge.s32.totalorder %s565_s14, 1 }
   0xb   : > { %p638_p6 = por %p111_p3, %p79_p0  ;;  %p118_p7 = scmp.lt.s32.totalorder %s565_s14, 3 }
   0xc   : > { %s783_s19 = scalar_select %p633_p4, 1, 0 }
   0xd   : > { %s784_s20 = scalar_select %p638_p6, 1, 0 }
   0xe   : > { %p643_p8 = pnand %p333_p5, %p118_p7  ;;  %s567_s22 = smov [#allocation2]  }
   0xf   : > { %s133_s23 = sshll.u32 %s567_s22, 4  ;;  %s28_s25 = sadd.s32 1, %s561_s13  ;;  %s134_s23 = int_to_ptr.vmem [resolvable:$true] %s133_s23 }
  0x10   : > { %p358_p9 = pneg %p643_p8  ;;  %s438_s26 = scalar_lea.vmem %s134_s23, 256 }
  0x11   : > { %p439_p13 = scmp.ne.s32.totalorder %s134_s23, %s438_s26  ;;  %p446_p5 = scmp.lt.s32.totalorder %s134_s23, %s134_s23 }
  0x12   : > { %p652_p11 = pnand %p358_p9, %p623_p1  ;;  %p447_p7 = scmp.lt.s32.totalorder %s438_s26, %s438_s26 }
  0x14   : > { %p429_p12 = pneg %p652_p11  ;;  %p448_p6 = por %p447_p7, %p446_p5 }
  0x16   : > { %p441_p0 = pnand %p439_p13, %p429_p12 }
  0x18   : > { %p442_p3 = pneg %p441_p0 }
  0x1a   : > { %p449_p4 = pnand %p448_p6, %p442_p3 }
  0x1c   : > { %452 = shalt.err (!%p449_p4)
}
  0x1d   : > { %s780_s27 = smov 128   ;;  %s569_s28 = smov 8  }
  0x1e   : > { %361 = dma.hbm_to_vmem [thread:$0]  (!%p652_p11), %s776_s0, 256, %s134_s23, [#allocation3], %s780_s27, %s780_s27, %s569_s28  }
  0x1f   : > { %p29_p4 = scmp.ge.s32.totalorder %s28_s25, 2  ;;  %s66_s3 = sadd.s32 1, %s553_s11 }
  0x20   : > { %p73_p6 = scmp.ne.s32.totalorder %s553_s11, %s549_s10  ;;  %p74_p9 = scmp.eq.s32.totalorder %s565_s14, 0 }
  0x21   : > { %s800_s25 = smov (%p29_p4, %s28_s25), 0  ;;  %p371_p0 = scmp.lt.s32.totalorder %s565_s14, 2 }
  0x22   : > { %p673_p12 = por %p74_p9, %p73_p6  ;;  %p679_p13 = por %p627_p2, %p73_p6 }
  0x23   : > { %s61_s6 = ssub.s32 %s561_s13, %s800_s25  ;;  %s147_s7 = sand.u32 1, %s553_s11  }
  0x24   : > { %p64_p11 = scmp.eq.s32.totalorder %s61_s6, 0  ;;  %s336_s8 = sshll.u32 %s147_s7, 4 }
  0x25   : > { %s348_s16 = sshll.u32 %s561_s13, 8  ;;  %s151_s26 = scalar_lea.vmem [#allocation5], %s336_s8 }
  0x26   : > { %s688_s15 = scalar_select %p64_p11, %s553_s11, %s66_s3  }
  0x27   : > { %s159_s24 = scalar_lea.hbm %s777_s1, %s348_s16  ;;  %s160_s29 = sshll.u32 %s151_s26, 4  ;;  %s161_s29 = int_to_ptr.vmem [resolvable:$true] %s160_s29 }
  0x28   : > { %p696_p2 = pnand %p371_p0, %p673_p12  ;;  %s148_s30 = scalar_lea.sflag [#allocation6], %s147_s7 }
  0x29   : > { %s466_s6 = scalar_lea.vmem %s161_s29, 256  ;;  %s570_s3 = smov [#allocation5]  }
  0x2a   : > { %p455_p3 = pneg %p696_p2  ;;  %p467_p5 = scmp.ne.s32.totalorder %s161_s29, %s466_s6 }
  0x2b   : > { %s471_s27 = sshll.u32 %s570_s3, 4  ;;  %s472_s27 = int_to_ptr.vmem [resolvable:$false] %s471_s27 }
  0x2c   : > { %p469_p7 = pnand %p467_p5, %p455_p3  ;;  %s473_s16 = scalar_lea.vmem %s472_s27, 512 }
  0x2d   : > { %p474_p6 = scmp.lt.s32.totalorder %s161_s29, %s472_s27  ;;  %p475_p9 = scmp.lt.s32.totalorder %s473_s16, %s466_s6 }
  0x2e   : > { %p470_p4 = pneg %p469_p7 }
  0x2f   : > { %p476_p11 = por %p475_p9, %p474_p6 }
  0x31   : > { %p477_p10 = pnand %p476_p11, %p470_p4 }
  0x33   : > { %480 = shalt.err (!%p477_p10)
}
  0x34   : > { %s790_s4 = smov 128   ;;  %172 = sbr.rel (%p643_p8) target bundleno = 87 (0x57), region = 28 }
  0x35   : > { %365 = dma.hbm_to_vmem [thread:$0]  (!%p696_p2), %s159_s24, 256, %s161_s29, %s148_s30, %s790_s4, %s790_s4, %s569_s28  }
  0x39   : > { %532 = dma.done.wait (%p623_p1), [#allocation3], 256  }
  0x3a   : > { %534 = vsyncadd (%p623_p1), [#allocation3], 4294967040  ;;  %s714_s27 = sand.u32 1, %s549_s10   ;;  %p791_p10 = scmp.ne.s32.totalorder %s783_s19, 0 }
  0x3b   : > { %s341_s7 = sshll.u32 %s714_s27, 4  ;;  %s179_s8 = scalar_lea.sflag [#allocation6], %s714_s27 }
  0x3c   : > { %s182_s22 = scalar_lea.vmem [#allocation5], %s341_s7 }
  0x3d   : > { %536 = dma.done.wait (%p791_p10), %s179_s8, 256  }
  0x3e   : > { %538 = vsyncadd (%p791_p10), %s179_s8, 4294967040  ;;  %s202_s21 = scalar_lea.vmem [#allocation7], %s341_s7  ;;  %s349_s28 = sshll.u32 %s557_s12, 8  ;;  %v206_v0 = vld [vmem:[%s182_s22] sm:$0xff]  ;;  %v207_v2 = vld [vmem:[%s182_s22 + $0x8] sm:$0xff] }
  0x3f   : > { %s230_s17 = sshll.u32 %s202_s21, 4  ;;  %v208_v1 = vld [vmem:[#allocation2] sm:$0xff]  ;;  %v209_v4 = vld [vmem:[#allocation2 + $0x8] sm:$0xff]  ;;  %s728_s19 = scalar_lea.hbm %s778_s2, %s349_s28  ;;  %s723_s17 = int_to_ptr.vmem [resolvable:$true] %s230_s17 }
  0x40   : > { %v210_v3 = vadd.f32 %v208_v1, %v206_v0  ;;  %v211_v5 = vadd.f32 %v209_v4, %v207_v2  ;;  %s215_s26 = scalar_lea.sflag [#allocation4], %s714_s27  ;;  %s481_s12 = scalar_lea.vmem %s723_s17, 256 }
  0x41   : > { %p482_p1 = scmp.ne.s32.totalorder %s723_s17, %s481_s12  ;;  %s571_s29 = smov [#allocation7]  }
  0x42   : > { %212 = vst [vmem:[%s202_s21] sm:$0xff] %v210_v3  ;;  %213 = vst [vmem:[%s202_s21 + $0x8] sm:$0xff] %v211_v5  ;;  %s485_s18 = sshll.u32 %s571_s29, 4  ;;  %s486_s18 = int_to_ptr.vmem [resolvable:$false] %s485_s18 }
  0x43   : > { %p483_p8 = pnand %p482_p1, %p679_p13  ;;  %s487_s30 = scalar_lea.vmem %s486_s18, 512 }
  0x44   : > { %p488_p0 = scmp.lt.s32.totalorder %s723_s17, %s486_s18  ;;  %p489_p2 = scmp.lt.s32.totalorder %s487_s30, %s481_s12 }
  0x45   : > { %p484_p12 = pneg %p483_p8 }
  0x46   : > { %p490_p3 = por %p489_p2, %p488_p0 }
  0x48   : > { %p491_p5 = pnand %p490_p3, %p484_p12 }
  0x4a   : > { %494 = shalt.err (!%p491_p5)
}
  0x4b   : > { %s495_s6 = scalar_lea.hbm %s728_s19, 256  ;;  %s499_s4 = scalar_lea.hbm %s778_s2, 512 }
  0x4c   : > { %p496_p7 = scmp.ne.s32.totalorder %s728_s19, %s495_s6  ;;  %p500_p9 = scmp.lt.s32.totalorder %s728_s19, %s778_s2 }
  0x4d   : > { %p501_p11 = scmp.lt.s32.totalorder %s499_s4, %s495_s6 }
  0x4e   : > { %p497_p4 = pnand %p496_p7, %p679_p13 }
  0x4f   : > { %p502_p10 = por %p501_p11, %p500_p9 }
  0x50   : > { %p498_p6 = pneg %p497_p4 }
  0x52   : > { %p503_p1 = pnand %p502_p10, %p498_p6 }
  0x54   : > { %506 = shalt.err (!%p503_p1)
}
  0x55   : > { %s572_s22 = smov 128   ;;  %s573_s21 = smov 8  }
  0x56   : > { %356 = dma.vmem_to_hbm [thread:$0]  (%p679_p13), %s723_s17, 256, %s728_s19, %s215_s26, %s572_s22, %s572_s22, %s573_s21  }
  0x57 PF: > { %s245_s28 = sand.u32 1, %s545_s9   ;;  %p792_p8 = scmp.ne.s32.totalorder %s784_s20, 0 }
  0x58   : > { %p793_p12 = scmp.ge.s32.totalorder %s565_s14, 2  ;;  %s246_s23 = scalar_lea.sflag [#allocation4], %s245_s28 }
  0x5a   : > { %p367_p0 = pnand %p793_p12, %p792_p8 }
  0x5c   : > { %p368_p2 = pneg %p367_p0 }
  0x5e   : > { %540 = dma.done.wait (%p368_p2), %s246_s23, 256  }
  0x5f   : > { %542 = vsyncadd (%p368_p2), %s246_s23, 4294967040  ;;  %s19_s14 = sadd.s32 1, %s565_s14   ;;  %s794_s9 = smov %s549_s10 }
  0x60   : > { %p16_p3 = scmp.ge.s32.totalorder %s19_s14, 4   ;;  %s795_s10 = smov %s553_s11 }
  0x61   : > { %s796_s11 = smov %s688_s15  ;;  %s797_s12 = smov %s561_s13 }
  0x62   : > { %s798_s13 = smov %s800_s25  ;;  %18 = sbr.rel (!%p16_p3) target bundleno = 7 (0x7), region = 79 }
  0x67   :  { %251 = vsyncpa [#allocation3], 1 }
  0x68   :  { %253 = vsyncpa [#allocation3 + $0x1], 1 }
  0x69   :  { %254 = vsyncpa [#allocation6], 1 }
  0x6a   :  { %256 = vsyncpa [#allocation6 + $0x1], 1 }
  0x6b   :  { %257 = vsyncpa [#allocation4], 1 }
  0x6c   :  { %259 = vsyncpa [#allocation4 + $0x1], 1 }

</bundles_post_ra>
